<compile_context>
chip_gen: v7x
topology: tpu7x:2x2x1
jax: 0.10.0
libtpu: 0.0.40
codegen_flags: <defaults>
</compile_context>

<pallas_src>
import jax
import jax.numpy as jnp
import numpy as np
from jax.experimental import pallas as pl
from jax.experimental.pallas import tpu as pltpu

OUT_LANES = 128  # lane-dense padding for the 4-wide loc_fc output


# ---------------------------------------------------------------------------
# Support branch (runs once, outside the gridded mlp loop):
# conv1 (3x3, pad=1; bias + eval-mode BatchNorm folded) + ReLU + support_fc,
# producing the relate_locator scale (1 + k[c]) lane-broadcast to (C, HW).
# ---------------------------------------------------------------------------
def support_kernel(p_ref, wcf_ref, cs_ref, ct_ref, wf1t_ref, bf1_ref,
                   wf2t_ref, bf2_ref, scale_ref):
    f32 = jnp.float32
    # conv1 as im2col matmul, channels in sublanes; conv bias + BN folded into affine.
    z2 = jnp.dot(wcf_ref[...], p_ref[...], preferred_element_type=f32)          # (C, HW)
    z2 = jnp.maximum(z2 * cs_ref[...] + ct_ref[...], 0.0)
    # support_fc: Linear(HW->C) then Linear(C->1); both stay MXU matmuls, k lands per-row.
    h = jnp.dot(z2, wf1t_ref[...], preferred_element_type=f32) + bf1_ref[...]   # (C, C)
    kc = jnp.dot(h, wf2t_ref[...], preferred_element_type=f32) + bf2_ref[...]   # (C, 1)
    # relate_locator (depthwise 1x1 cross-corr + residual) == per-channel scale 1 + k[c];
    # lane-broadcast so the gridded mlp kernel can stream it per K-tile.
    scale_ref[...] = jnp.broadcast_to(1.0 + kc, scale_ref.shape)                # (C, HW)


# ---------------------------------------------------------------------------
# Gridded mlp[0] (K-tiled, f32 accumulator) with mlp[2] + loc_fc fused into the
# last-K-step finalize.  Weights are bf16, accumulation f32.
# ---------------------------------------------------------------------------
def mlp_kernel(x_ref, scale_ref, wm1_ref, bm1_ref, wm2_ref, bm2_ref,
               wl_ref, bl_ref, out_ref, acc_ref):
    k = pl.program_id(1)

    @pl.when(k == 0)
    def _():
        acc_ref[...] = jnp.zeros_like(acc_ref)

    # Data-dependent per-channel scale applied in f32, then cast to bf16 for the MXU.
    xs = (x_ref[...] * scale_ref[...]).astype(jnp.bfloat16)                      # (tm, tk)
    acc_ref[...] += jnp.dot(xs, wm1_ref[...], preferred_element_type=jnp.float32)

    @pl.when(k == pl.num_programs(1) - 1)
    def _():
        v = jnp.maximum(acc_ref[...] + bm1_ref[...], 0.0)                        # mlp[0]+ReLU
        v = jnp.maximum(jnp.dot(v.astype(jnp.bfloat16), wm2_ref[...],
                                preferred_element_type=jnp.float32)
                        + bm2_ref[...], 0.0)                                     # mlp[2]+ReLU
        out_ref[...] = (jnp.dot(v.astype(jnp.bfloat16), wl_ref[...],
                                preferred_element_type=jnp.float32)
                        + bl_ref[...])                                           # loc_fc


def init_params(key, pro_size, channels, representation_size):
    HW = pro_size ** 2
    C, R = channels, representation_size
    ks = jax.random.split(key, 6)
    wc = 0.01 * jax.random.normal(ks[0], (C, C, 3, 3), jnp.float32)   # Conv2d weight (std=0.01)
    bc = jnp.zeros((C,), jnp.float32)
    gamma = jnp.ones((C,), jnp.float32)                               # BatchNorm defaults
    beta = jnp.zeros((C,), jnp.float32)
    rmean = jnp.zeros((C,), jnp.float32)
    rvar = jnp.ones((C,), jnp.float32)
    wf1 = 0.001 * jax.random.normal(ks[1], (C, HW), jnp.float32)      # support_fc[0]
    bf1 = jnp.zeros((C,), jnp.float32)
    wf2 = 0.001 * jax.random.normal(ks[2], (1, C), jnp.float32)       # support_fc[1]
    bf2 = jnp.zeros((1,), jnp.float32)
    wm1 = 0.01 * jax.random.normal(ks[3], (R, C * HW), jnp.float32)   # mlp[0]
    bm1 = jnp.zeros((R,), jnp.float32)
    wm2 = 0.01 * jax.random.normal(ks[4], (R, R), jnp.float32)        # mlp[2]
    bm2 = jnp.zeros((R,), jnp.float32)
    wl = 0.01 * jax.random.normal(ks[5], (4, R), jnp.float32)         # loc_fc
    bl = jnp.zeros((4,), jnp.float32)
    return (wc, bc, gamma, beta, rmean, rvar, wf1, bf1, wf2, bf2,
            wm1, bm1, wm2, bm2, wl, bl)


def _pick_tk(K):
    # 256-aligned K-tiles (v6e/v7x MXU); prefer >= 2 K-steps so the accumulate/finalize
    # path is exercised.  TODO(synk): sweep 1024-8192 at production C*HW against the
    # 64 MiB v7x VMEM budget (2x double-buffered wm1 tiles + resident wm2/wl + acc).
    if K >= 1024 and K % 512 == 0:
        return 512
    for t in (256, 128):
        if K % t == 0:
            return t
    return K


def locator_forward(x, z, params):
    B, C, H, W = x.shape
    Nz = z.shape[0]
    HW = H * W
    K = C * HW
    # mlp input dim is channels*pro_size**2, so the flattened res requires Nz == 1.
    assert Nz == 1 and H == W and z.shape[1] == C

    (wc, bc, gamma, beta, rmean, rvar,
     wf1, bf1, wf2, bf2, wm1, bm1, wm2, bm2, wl, bl) = params
    R = wm1.shape[0]
    f32, bf16 = jnp.float32, jnp.bfloat16

    # ------------------------- support kernel (f32, runs once) -------------------------
    # im2col of the support image in one XLA op.  Patch-channel order is
    # (input channel slowest, ky, kx fastest) == wc.reshape(C, C*9)  (validated vs. reference).
    patches = jax.lax.conv_general_dilated_patches(
        z, (3, 3), (1, 1), ((1, 1), (1, 1)),
        dimension_numbers=("NCHW", "OIHW", "NCHW"))                   # (1, C*9, H, W)
    p_mat = patches.reshape(C * 9, HW)                                # (C*9, HW)
    wcf = wc.reshape(C, C * 9)
    bn_scale = gamma / jnp.sqrt(rvar + 1e-5)                          # eval-mode BatchNorm
    cs_col = bn_scale.reshape(C, 1)
    ct_col = ((bc - rmean) * bn_scale + beta).reshape(C, 1)
    wf1t = wf1.T                                                      # (HW, C)
    bf1_row = bf1.reshape(1, C)
    wf2t = wf2.T                                                      # (C, 1)
    bf2_2d = bf2.reshape(1, 1)
    # TODO(synk): at production C, cast p_mat/wcf/wf1t to bf16 too (wcf is ~C*9*C*4 bytes f32).

    sup_inputs = (p_mat, wcf, cs_col, ct_col, wf1t, bf1_row, wf2t, bf2_2d)
    sup_flops = 2 * (C * (C * 9) * HW + C * HW * C + C * C)
    sup_bytes = sum(int(np.prod(a.shape)) * 4 for a in sup_inputs) + C * HW * 4
    scale_chw = pl.pallas_call(
        support_kernel,
        out_shape=jax.ShapeDtypeStruct((C, HW), f32),
        in_specs=[pl.BlockSpec(memory_space=pltpu.MemorySpace.VMEM) for _ in sup_inputs],
        out_specs=pl.BlockSpec(memory_space=pltpu.MemorySpace.VMEM),
        cost_estimate=pl.CostEstimate(flops=int(sup_flops), transcendentals=0,
                                      bytes_accessed=int(sup_bytes)),
    )(*sup_inputs)
    # Channel-slowest flattening matches torch's x.flatten(1) / x.reshape(B, C*HW).
    scale_flat = scale_chw.reshape(1, K)

    # --------------------------- gridded mlp + loc_fc kernel ---------------------------
    R_pad = ((R + 127) // 128) * 128
    B_pad = ((B + 7) // 8) * 8                     # sublane-aligned batch (padded rows are 0)
    tm = min(B_pad, 128)
    B_pad = ((B_pad + tm - 1) // tm) * tm
    tk = _pick_tk(K)
    NM, NK = B_pad // tm, K // tk

    x_flat = x.reshape(B, K)
    x_pad = jnp.zeros((B_pad, K), f32).at[:B, :].set(x_flat)
    # bf16 weight streams, zero-padded to lane-aligned widths; biases stay f32.
    wm1_bf = jnp.zeros((K, R_pad), bf16).at[:, :R].set(wm1.T.astype(bf16))
    bm1_pad = jnp.zeros((1, R_pad), f32).at[0, :R].set(bm1)
    wm2_bf = jnp.zeros((R_pad, R_pad), bf16).at[:R, :R].set(wm2.T.astype(bf16))
    bm2_pad = jnp.zeros((1, R_pad), f32).at[0, :R].set(bm2)
    wl_bf = jnp.zeros((R_pad, OUT_LANES), bf16).at[:R, :4].set(wl.T.astype(bf16))
    bl_pad = jnp.zeros((1, OUT_LANES), f32).at[0, :4].set(bl)

    mlp_inputs = (x_pad, scale_flat, wm1_bf, bm1_pad, wm2_bf, bm2_pad, wl_bf, bl_pad)

    grid_spec = pltpu.PrefetchScalarGridSpec(
        num_scalar_prefetch=0,
        grid=(NM, NK),
        in_specs=[
            pl.BlockSpec((tm, tk), lambda m, k: (m, k)),               # x (f32)
            pl.BlockSpec((1, tk), lambda m, k: (0, k)),                # per-channel scale (f32)
            # TODO(synk): pipeline_mode=pl.Buffered(3) on this K-stream for v5e DMA hiding.
            pl.BlockSpec((tk, R_pad), lambda m, k: (k, 0)),            # wm1 (bf16), streamed
            pl.BlockSpec((1, R_pad), lambda m, k: (0, 0)),             # bm1
            pl.BlockSpec((R_pad, R_pad), lambda m, k: (0, 0)),         # wm2 (bf16), resident
            pl.BlockSpec((1, R_pad), lambda m, k: (0, 0)),             # bm2
            pl.BlockSpec((R_pad, OUT_LANES), lambda m, k: (0, 0)),     # loc_fc W (bf16)
            pl.BlockSpec((1, OUT_LANES), lambda m, k: (0, 0)),         # loc_fc b
        ],
        out_specs=pl.BlockSpec((tm, OUT_LANES), lambda m, k: (m, 0)),
        scratch_shapes=[pltpu.VMEM((tm, R_pad), jnp.float32)],         # f32 accumulator
    )

    mlp_flops = (2 * (B_pad * K * R_pad + B_pad * R_pad * R_pad + B_pad * R_pad * OUT_LANES)
                 + B_pad * K)
    mlp_bytes = (x_pad.size * 4 + scale_flat.size * 4 + wm1_bf.size * 2 + bm1_pad.size * 4
                 + wm2_bf.size * 2 + bm2_pad.size * 4 + wl_bf.size * 2 + bl_pad.size * 4
                 + B_pad * OUT_LANES * 4)

    out_pad = pl.pallas_call(
        mlp_kernel,
        out_shape=jax.ShapeDtypeStruct((B_pad, OUT_LANES), f32),
        grid_spec=grid_spec,
        compiler_params=pltpu.CompilerParams(
            # B-tile axis can shard across v7x's 2 TensorCores; K is the reduction axis.
            dimension_semantics=("parallel", "arbitrary"),
            # Explicit budget below v7x's 64 MiB physical VMEM (fine on v5e/v6e's 128 MiB).
            vmem_limit_bytes=48 * 1024 * 1024,
        ),
        cost_estimate=pl.CostEstimate(flops=int(mlp_flops), transcendentals=0,
                                      bytes_accessed=int(mlp_bytes)),
    )(*mlp_inputs)
    return out_pad[:B, :4]


def reference_forward(x, z, params):
    """Pure-JAX (f32) replica of LocatorNet.forward (eval-mode BatchNorm)."""
    (wc, bc, gamma, beta, rmean, rvar,
     wf1, bf1, wf2, bf2, wm1, bm1, wm2, bm2, wl, bl) = params
    B, C, H, W = x.shape
    z1 = jax.lax.conv_general_dilated(
        z, wc, (1, 1), ((1, 1), (1, 1)),
        dimension_numbers=("NCHW", "OIHW", "NCHW")) + bc[None, :, None, None]
    z1 = ((z1 - rmean[None, :, None, None])
          / jnp.sqrt(rvar[None, :, None, None] + 1e-5)
          * gamma[None, :, None, None] + beta[None, :, None, None])
    z1 = jnp.maximum(z1, 0.0)
    z2 = z1.reshape(z.shape[0], C, H * W)
    h = z2 @ wf1.T + bf1
    k = h @ wf2.T + bf2                                   # (1, C, 1)
    scale = 1.0 + k[0, :, 0]                              # depthwise 1x1 corr + residual
    res = (x * scale[None, :, None, None]).reshape(B, -1)
    v = jnp.maximum(res @ wm1.T + bm1, 0.0)
    v = jnp.maximum(v @ wm2.T + bm2, 0.0)
    return v @ wl.T + bl


if __name__ == "__main__":
    pro_size, channels, representation_size = 16, 4, 32
    key = jax.random.PRNGKey(0)
    kx, kz, kp = jax.random.split(key, 3)
    x = jax.random.normal(kx, (2, channels, pro_size, pro_size), jnp.float32)
    z = jax.random.normal(kz, (1, channels, pro_size, pro_size), jnp.float32)
    params = init_params(kp, pro_size, channels, representation_size)

    out = jax.block_until_ready(locator_forward(x, z, params))
    ref = jax.block_until_ready(reference_forward(x, z, params))
    # bf16 weight streams with f32 accumulation -> relaxed tolerance vs. the f32 reference.
    np.testing.assert_allclose(np.asarray(out), np.asarray(ref), rtol=2e-2, atol=5e-4)
    print("KERNEL_OK")
</pallas_src>

<mosaic_0001>
module attributes {stable_mosaic.version = 11 : i64} {
  func.func @support_kernel(%arg0: memref<36x256xf32, #tpu.memory_space<vmem>>, %arg1: memref<4x36xf32, #tpu.memory_space<vmem>>, %arg2: memref<4x1xf32, #tpu.memory_space<vmem>>, %arg3: memref<4x1xf32, #tpu.memory_space<vmem>>, %arg4: memref<256x4xf32, #tpu.memory_space<vmem>>, %arg5: memref<1x4xf32, #tpu.memory_space<vmem>>, %arg6: memref<4x1xf32, #tpu.memory_space<vmem>>, %arg7: memref<1x1xf32, #tpu.memory_space<vmem>>, %arg8: memref<4x256xf32, #tpu.memory_space<vmem>>) attributes {dimension_semantics = [], scalar_prefetch = 0 : i64, scratch_operands = 0 : i64, tpu.core_type = #tpu.core_type<tc>} {
    %c0 = arith.constant 0 : index
    %c0_0 = arith.constant 0 : index
    %0 = vector.load %arg1[%c0, %c0_0] : memref<4x36xf32, #tpu.memory_space<vmem>>, vector<4x36xf32>
    %c0_1 = arith.constant 0 : index
    %c0_2 = arith.constant 0 : index
    %1 = vector.load %arg0[%c0_1, %c0_2] : memref<36x256xf32, #tpu.memory_space<vmem>>, vector<36x256xf32>
    %cst = arith.constant dense<0.000000e+00> : vector<4x256xf32>
    %2 = tpu.matmul %0, %1, %cst {dimension_numbers = #tpu.dot_dimension_numbers<[1], [0], [0], [1], [0, 0, 1, 1], [], []>} : vector<4x36xf32>, vector<36x256xf32>, vector<4x256xf32> -> vector<4x256xf32>
    %c0_3 = arith.constant 0 : index
    %c0_4 = arith.constant 0 : index
    %3 = vector.load %arg2[%c0_3, %c0_4] : memref<4x1xf32, #tpu.memory_space<vmem>>, vector<4x1xf32>
    %4 = vector.broadcast %3 : vector<4x1xf32> to vector<4x256xf32>
    %5 = arith.mulf %2, %4 : vector<4x256xf32>
    %c0_5 = arith.constant 0 : index
    %c0_6 = arith.constant 0 : index
    %6 = vector.load %arg3[%c0_5, %c0_6] : memref<4x1xf32, #tpu.memory_space<vmem>>, vector<4x1xf32>
    %7 = vector.broadcast %6 : vector<4x1xf32> to vector<4x256xf32>
    %8 = arith.addf %5, %7 : vector<4x256xf32>
    %cst_7 = arith.constant 0.000000e+00 : f32
    %9 = vector.broadcast %cst_7 : f32 to vector<4x256xf32>
    %10 = arith.maximumf %8, %9 : vector<4x256xf32>
    %c0_8 = arith.constant 0 : index
    %c0_9 = arith.constant 0 : index
    %11 = vector.load %arg4[%c0_8, %c0_9] : memref<256x4xf32, #tpu.memory_space<vmem>>, vector<256x4xf32>
    %cst_10 = arith.constant dense<0.000000e+00> : vector<4x4xf32>
    %12 = tpu.matmul %10, %11, %cst_10 {dimension_numbers = #tpu.dot_dimension_numbers<[1], [0], [0], [1], [0, 0, 1, 1], [], []>} : vector<4x256xf32>, vector<256x4xf32>, vector<4x4xf32> -> vector<4x4xf32>
    %c0_11 = arith.constant 0 : index
    %c0_12 = arith.constant 0 : index
    %13 = vector.load %arg5[%c0_11, %c0_12] : memref<1x4xf32, #tpu.memory_space<vmem>>, vector<1x4xf32>
    %14 = vector.broadcast %13 : vector<1x4xf32> to vector<4x4xf32>
    %15 = arith.addf %12, %14 : vector<4x4xf32>
    %c0_13 = arith.constant 0 : index
    %c0_14 = arith.constant 0 : index
    %16 = vector.load %arg6[%c0_13, %c0_14] : memref<4x1xf32, #tpu.memory_space<vmem>>, vector<4x1xf32>
    %cst_15 = arith.constant dense<0.000000e+00> : vector<4x1xf32>
    %17 = tpu.matmul %15, %16, %cst_15 {dimension_numbers = #tpu.dot_dimension_numbers<[1], [0], [0], [1], [0, 0, 1, 1], [], []>} : vector<4x4xf32>, vector<4x1xf32>, vector<4x1xf32> -> vector<4x1xf32>
    %c0_16 = arith.constant 0 : index
    %c0_17 = arith.constant 0 : index
    %18 = vector.load %arg7[%c0_16, %c0_17] : memref<1x1xf32, #tpu.memory_space<vmem>>, vector<1x1xf32>
    %19 = vector.broadcast %18 : vector<1x1xf32> to vector<4x1xf32>
    %20 = arith.addf %17, %19 : vector<4x1xf32>
    %cst_18 = arith.constant 1.000000e+00 : f32
    %21 = vector.broadcast %cst_18 : f32 to vector<4x1xf32>
    %22 = arith.addf %21, %20 : vector<4x1xf32>
    %23 = vector.shape_cast %22 : vector<4x1xf32> to vector<4x1xf32>
    %24 = vector.broadcast %23 : vector<4x1xf32> to vector<4x256xf32>
    %c0_19 = arith.constant 0 : index
    %c0_20 = arith.constant 0 : index
    %25 = vector.load %arg8[%c0_19, %c0_20] : memref<4x256xf32, #tpu.memory_space<vmem>>, vector<4x256xf32>
    tpu.vector_store %arg8[%c0_19, %c0_20], %24 {strides = array<i32>} : memref<4x256xf32, #tpu.memory_space<vmem>>, vector<4x256xf32>,
    return
  }
}

</mosaic_0001>

<bundles_post_ra>
// kernel: tpu_custom_call.1
= control target key start
LH: loop header
LB: loop body
LE: loop exit
PB: predicated region body
PF: predicated region fallthrough
CT: control target
= control target key end

     0   :  { %s697_s0 = inlined_call_operand.vmem [shape: f32[36,256], index: 0, kind: input, shape index: {}]   ;;  %s698_s1 = inlined_call_operand.vmem [shape: f32[4,36], index: 1, kind: input, shape index: {}]   ;;  %s699_s2 = inlined_call_operand.vmem [shape: f32[4,1], index: 2, kind: input, shape index: {}]   ;;  %s700_s3 = inlined_call_operand.vmem [shape: f32[4,1], index: 3, kind: input, shape index: {}]   ;;  %s701_s4 = inlined_call_operand.vmem [shape: f32[256,4], index: 4, kind: input, shape index: {}]   ;;  %s702_s5 = inlined_call_operand.vmem [shape: f32[1,4], index: 5, kind: input, shape index: {}]   ;;  %s703_s6 = inlined_call_operand.vmem [shape: f32[4,1], index: 6, kind: input, shape index: {}]   ;;  %s704_s7 = inlined_call_operand.<no memory space> [shape: f32[1,1], index: 7, kind: input, shape index: {}]   ;;  %s705_s8 = inlined_call_operand.hbm [shape: f32[4,256], index: 8, kind: output, shape index: {}]  }
   0x1   :  { %v13_v0 = vstv %s704_s7 }
   0x2   :  { %14 = vst [vmem:[#allocation2] sm:$0x1] %v13_v0 }
   0x3   :  { %v34_v1 = vld [vmem:[%s697_s0 + $0x8] sm:$0xff]  ;;  %v36_v2 = vld [vmem:[%s697_s0 + $0x18] sm:$0xff]  ;;  %v33_v3 = vld [vmem:[%s697_s0] sm:$0xff]  ;;  %v485_v8 = vmov 0.0   ;;  %v486_v13 = vmov 0   ;;  %vm47_vm0 = vcmask 1043456  }
   0x4   :  { %v414_v4 = vpack.c.bf16 %v36_v2, %v34_v1  ;;  %v35_v5 = vld [vmem:[%s697_s0 + $0x10] sm:$0xff]  ;;  %v38_v6 = vld [vmem:[%s697_s0 + $0x28] sm:$0xff]  ;;  %v40_v7 = vld [vmem:[%s697_s0 + $0x38] sm:$0xff]  ;;  %118 = vmatprep.mubr.f32.mxu0 %v485_v8  ;;  %459 = vset.pattern.permute.xlu0 %v486_v13  ;;  %vm43_vm1 = vcmask 293888  }
   0x5   :  { %v416_v9 = vpack.c.bf16 %v35_v5, %v33_v3  ;;  %v418_v10 = vpack.c.bf16 %v40_v7, %v38_v6  ;;  %v37_v11 = vld [vmem:[%s697_s0 + $0x20] sm:$0xff]  ;;  %v39_v12 = vld [vmem:[%s697_s0 + $0x30] sm:$0xff]  ;;  %460 = vset.pattern.permute.xlu1 %v486_v13  ;;  %v42_v16 = vld [vmem:[%s697_s0 + $0x48] sm:$0xf] }
   0x6   :  { %415 = vmatprep.subr.bf16.mxu0 %v414_v4  ;;  %v125_v14 = vld [vmem:[%s699_s2] sm:$0xf]  ;;  %v420_v15 = vpack.c.bf16 %v39_v12, %v37_v11  ;;  %v160_v19 = vld [vmem:[%s701_s4 + $0x88] sm:$0xff]  ;;  %v161_v23 = vld [vmem:[%s701_s4 + $0x90] sm:$0xff] }
   0x7   :  { %417 = vmatpush1.bf16.msra.mxu0 %v416_v9  ;;  %128 = vperm.xlu0 %459, %v125_v14   ;;  %v133_v17 = vld [vmem:[%s700_s3] sm:$0xf]  ;;  %v144_v22 = vld [vmem:[%s701_s4 + $0x8] sm:$0xff]  ;;  %v162_v25 = vld [vmem:[%s701_s4 + $0x98] sm:$0xff] }
   0x8   :  { %v159_v18 = vld [vmem:[%s701_s4 + $0x80] sm:$0xff]  ;;  %419 = vmatprep.subr.bf16.mxu0 %v418_v10  ;;  %v145_v26 = vld [vmem:[%s701_s4 + $0x10] sm:$0xff]  ;;  %v146_v27 = vld [vmem:[%s701_s4 + $0x18] sm:$0xff]  ;;  %v426_v28 = vpack.c.bf16 %v162_v25, %v161_v23 }
   0x9   :  { %v422_v20 = vpack.c.bf16 %v160_v19, %v159_v18  ;;  %v143_v21 = vld [vmem:[%s701_s4] sm:$0xff]  ;;  %v164_v30 = vld [vmem:[%s701_s4 + $0xa8] sm:$0xff]  ;;  %v428_v32 = vpack.c.bf16 %v146_v27, %v145_v26  ;;  %v165_v37 = vld [vmem:[%s701_s4 + $0xb0] sm:$0xff] }
   0xa   :  { %v424_v24 = vpack.c.bf16 %v144_v22, %v143_v21  ;;  %v163_v29 = vld [vmem:[%s701_s4 + $0xa0] sm:$0xff]  ;;  %v148_v36 = vld [vmem:[%s701_s4 + $0x28] sm:$0xff]  ;;  %v166_v38 = vld [vmem:[%s701_s4 + $0xb8] sm:$0xff] }
   0xb   :  { %423 = vmatprep.subr.bf16.mxu1 %v422_v20  ;;  %421 = vmatpush1.bf16.msra.mxu0 %v420_v15  ;;  %v41_v31 = vld [vmem:[%s697_s0 + $0x40] sm:$0xf]  ;;  %v430_v34 = vpack.c.bf16 %v164_v30, %v163_v29 }
   0xc   :  { %136 = vperm.xlu0 %459, %v133_v17   ;;  %365 = vmatprep.subr.msk.mxu0 %vm47_vm0, %v42_v16  ;;  %v32_v33 = vld [vmem:[%s698_s1] sm:$0xf] }
   0xd   :  { %425 = vmatpush3.bf16.msra.mxu1 %v424_v24  ;;  %v147_v35 = vld [vmem:[%s701_s4 + $0x20] sm:$0xff] }
   0xe   :  { %427 = vmatprep.subr.bf16.mxu1 %v426_v28 }
   0xf   :  { %366 = vmatpush1.msk.msra.mxu0 %vm47_vm0, %v41_v31 }
  0x10   :  { %15 = vsyncpa [#allocation4], 0  ;;  %367 = vmatmul.mubr.msk.f32.vlgmr.msra.gmra.mrb[0].mxu0 %vm43_vm1, %v32_v33  ;;  %v432_v39 = vpack.c.bf16 %v148_v36, %v147_v35  ;;  %v434_v40 = vpack.c.bf16 %v166_v38, %v165_v37  ;;  %v149_v41 = vld [vmem:[%s701_s4 + $0x30] sm:$0xff]  ;;  %v150_v42 = vld [vmem:[%s701_s4 + $0x38] sm:$0xff]  ;;  %409 = vmatprep.subr.mxu0 %v485_v8  ;;  %vm487_vm2 = vmmov 0   ;;  %vm260_vm3 = vcmask 31744  }
  0x11   :  { %429 = vmatpush3.bf16.msra.mxu1 %v428_v32  ;;  %v167_v43 = vld [vmem:[%s701_s4 + $0xc0] sm:$0xff]  ;;  %v168_v44 = vld [vmem:[%s701_s4 + $0xc8] sm:$0xff]  ;;  %v436_v45 = vpack.c.bf16 %v150_v42, %v149_v41  ;;  %v169_v49 = vld [vmem:[%s701_s4 + $0xd0] sm:$0xff]  ;;  %411 = vmatprep.mubr.msk.f32.mxu0 %vm487_vm2, %v485_v8  ;;  %v488_v26 = vmov 839922192   ;;  %v345_v28 = vlaneseq }
  0x12   :  { %431 = vmatprep.subr.bf16.mxu1 %v430_v34  ;;  %v438_v46 = vpack.c.bf16 %v168_v44, %v167_v43  ;;  %v151_v47 = vld [vmem:[%s701_s4 + $0x40] sm:$0xff]  ;;  %v152_v48 = vld [vmem:[%s701_s4 + $0x48] sm:$0xff]  ;;  %v170_v50 = vld [vmem:[%s701_s4 + $0xd8] sm:$0xff]  ;;  %v343_v27 = vunpack.c.l.s4 %v488_v26 }
  0x13   :  { %v440_v51 = vpack.c.bf16 %v152_v48, %v151_v47  ;;  %v442_v52 = vpack.c.bf16 %v170_v50, %v169_v49  ;;  %v153_v53 = vld [vmem:[%s701_s4 + $0x50] sm:$0xff]  ;;  %v154_v54 = vld [vmem:[%s701_s4 + $0x58] sm:$0xff]  ;;  %v171_v56 = vld [vmem:[%s701_s4 + $0xe0] sm:$0xff]  ;;  %v346_v29 = vshrl.u32 %v345_v28, 7 }
  0x14   :  { %v444_v55 = vpack.c.bf16 %v154_v54, %v153_v53  ;;  %v172_v57 = vld [vmem:[%s701_s4 + $0xe8] sm:$0xff]  ;;  %v155_v59 = vld [vmem:[%s701_s4 + $0x60] sm:$0xff]  ;;  %v173_v62 = vld [vmem:[%s701_s4 + $0xf0] sm:$0xff]  ;;  %v344_v8 = vunpack.c.0.s8 %v343_v27 }
  0x15   :  { %433 = vmatpush3.bf16.msra.mxu1 %v432_v39  ;;  %v446_v58 = vpack.c.bf16 %v172_v57, %v171_v56  ;;  %v156_v60 = vld [vmem:[%s701_s4 + $0x68] sm:$0xff]  ;;  %v174_v63 = vld [vmem:[%s701_s4 + $0xf8] sm:$0xff]  ;;  %v157_v1 = vld [vmem:[%s701_s4 + $0x70] sm:$0xff] }
  0x16   :  { %435 = vmatprep.subr.bf16.mxu1 %v434_v40  ;;  %v448_v61 = vpack.c.bf16 %v156_v60, %v155_v59  ;;  %v450_v0 = vpack.c.bf16 %v174_v63, %v173_v62  ;;  %v158_v2 = vld [vmem:[%s701_s4 + $0x78] sm:$0xff]  ;;  %v252_v15 = vld [vmem:[%s703_s6] sm:$0xf]  ;;  %v347_v30 = vsub.s32 %v344_v8, %v346_v29  ;;  %s489_s6 = smov [#allocation3]  }
  0x17   :  { %v452_v3 = vpack.c.bf16 %v158_v2, %v157_v1  ;;  %410 = vmatpush3.msk.msra.mxu0 %vm47_vm0, %v252_v15  ;;  %v368_v17 = vld [vmem:[%s702_s5] ss:$0 sm:$0xff]  ;;  %s357_s20 = sshll.u32 %s489_s6, 4  ;;  %s358_s20 = int_to_ptr.vmem [resolvable:$true] %s357_s20 }
  0x18   :  { %v369_v21 = vld [vmem:[#allocation2] ss:$0 sm:$0xff]  ;;  %s461_s5 = scalar_lea.vmem %s358_s20, 128  ;;  %p466_p1 = scmp.lt.s32.totalorder %s358_s20, %s358_s20 }
  0x19   :  { %437 = vmatpush3.bf16.msra.mxu1 %v436_v45  ;;  %p462_p0 = scmp.ne.s32.totalorder %s358_s20, %s461_s5  ;;  %p467_p2 = scmp.lt.s32.totalorder %s461_s5, %s461_s5 }
  0x1a   :  { %439 = vmatprep.subr.bf16.mxu1 %v438_v46 }
  0x1b   :  { %p468_p3 = por %p467_p2, %p466_p1 }
  0x1d   :  { %441 = vmatpush3.bf16.msra.mxu1 %v440_v51  ;;  %p469_p4 = pnand %p468_p3, %p462_p0 }
  0x1e   :  { %443 = vmatprep.subr.bf16.mxu1 %v442_v52 }
  0x21   :  { %445 = vmatpush3.bf16.msra.mxu1 %v444_v55 }
  0x22   :  { %447 = vmatprep.subr.bf16.mxu1 %v446_v58 }
  0x25   :  { %449 = vmatpush3.bf16.msra.mxu1 %v448_v61 }
  0x26   :  { %451 = vmatprep.subr.bf16.mxu1 %v450_v0 }
  0x29   :  { %453 = vmatpush3.bf16.msra.mxu1 %v452_v3 }
  0x86   :  { %v129_v4 = vpop.permute.xlu0 %128 }
  0x8b   :  { %v137_v9 = vpop.permute.xlu0 %136 }
  0xe3   :  { %v120_v5 = vpop.f32.mrb[0].mxu0 }
  0xe4   :  { %v131_v6 = vmul.f32 %v129_v4, %v120_v5  ;;  %v122_v7 = vpop.f32.mrb[1].mxu0 }
  0xe5   :  { %v132_v10 = vmul.f32 %v129_v4, %v122_v7 }
  0xe6   :  { %v139_v11 = vadd.f32 %v137_v9, %v131_v6 }
  0xe7   :  { %v140_v12 = vadd.f32 %v137_v9, %v132_v10 }
  0xe8   :  { %v141_v14 = vmax.f32 %v139_v11, 0.0 }
  0xe9   :  { %v142_v13 = vmax.f32 %v140_v12, 0.0 }
  0xeb   :  { %246 = vmatprep.mubr.f32.mxu1 %v142_v13 }
  0xec   :  { %247 = vmatmul.mubr.f32.vlgmr.msra.gmra.mrb[0].mxu1 %v141_v14 }
 0x1bf   :  { %v404_v16 = vpop.f32.mrb[0].mxu1 }
 0x1c0   :  { %v405_v18 = vpop.f32.mrb[1].mxu1 }
 0x1c1   :  { %v406_v19 = vadd.f32 %v405_v18, %v404_v16 }
 0x1c3   :  { %v249_v20 = vadd.f32 %v406_v19, %v368_v17 }
 0x1c5   :  { %412 = vmatmul.mubr.msk.f32.vlgmr.msra.gmra.mrb[2].mxu0 %vm260_vm3, %v249_v20 }
 0x298   :  { %v333_v22 = vpop.f32.mrb[2].mxu0 }
 0x299   :  { %v334_v23 = vadd.f32 %v369_v21, %v333_v22  ;;  %v413_v24 = vpop.f32.mrb[3].mxu0 }
 0x29b   :  { %v337_v25 = vadd.f32 1.0, %v334_v23 }
 0x29d   :  { %340 = vperm.xlu1 %460, %v337_v25  }
 0x31c   :  { %v341_v31 = vpop.permute.xlu1 %340 }
 0x31d   :  { %v348_v32 = vrot.slane %v341_v31, %v347_v30 }
 0x31f   :  { %350 = vst [vmem:[#allocation3] sm:$0xff] %v348_v32 }
 0x320   :  { %472 = shalt.err (!%p469_p4)
}
 0x321   :  { %s473_s23 = scalar_lea.hbm %s705_s8, 128 }
 0x322   :  { %p474_p5 = scmp.ne.s32.totalorder %s705_s8, %s473_s23  ;;  %p477_p6 = scmp.lt.u32.totalorder %s473_s23, %s705_s8 }
 0x324   :  { %p479_p7 = pnand %p477_p6, %p474_p5 }
 0x326   :  { %482 = shalt.err (!%p479_p7)
}
 0x327   :  { %360 = dma.vmem_to_hbm [thread:$0]  %s358_s20, 128, %s705_s8, [#allocation4]  }
 0x328   :  { %483 = dma.done.wait [#allocation4], 128  }
 0x329   :  { %484 = vsyncadd [#allocation4], 4294967168 }
 0x32a   :  { %364 = vsyncpa [#allocation4], 1 }

</bundles_post_ra>
